<compile_context>
chip_gen: v6e
topology: v6e:2x2x1
jax: 0.10.0
libtpu: 0.0.40
codegen_flags: <defaults>
</compile_context>

<pallas_src>
import jax
import jax.numpy as jnp
from jax.experimental import pallas as pl
from jax.experimental.pallas import tpu as pltpu


def _round_up(a: int, b: int) -> int:
    return (a + b - 1) // b * b


# ----------------------------- Pallas kernel --------------------------------
def _qlinear_kernel(scale_ref, zp_ref, x_ref, wq_ref, bias_ref, o_ref,
                    acc_ref, rs_ref):
    """Grid = (M//tm, N//tn, K//tk); K (reduction) is the innermost axis.

    x_ref   : (tm, tk) bf16   activations
    wq_ref  : (tk, tn) uint8  quantized weight, already (K, N) layout
    bias_ref: (1,  tn) f32
    o_ref   : (tm, tn) f32
    acc_ref : (tm, tn) f32    matmul accumulator (scratch)
    rs_ref  : (tm, 1)  f32    rowsum(x) accumulator (scratch, for zp folding)
    """
    k = pl.program_id(2)

    @pl.when(k == 0)
    def _init():
        acc_ref[...] = jnp.zeros_like(acc_ref)
        rs_ref[...] = jnp.zeros_like(rs_ref)

    x = x_ref[...]                                      # (tm, tk) bf16
    # uint8 -> bf16 is exact (0..255 fit in bf16); the affine (scale, zp) is
    # applied in the epilogue, never over the K*N tile.
    w = wq_ref[...].astype(jnp.bfloat16)                # (tk, tn) bf16
    acc_ref[...] += jnp.dot(x, w, preferred_element_type=jnp.float32)
    rs_ref[...] += jnp.sum(x.astype(jnp.float32), axis=-1, keepdims=True)

    @pl.when(k == pl.num_programs(2) - 1)
    def _finalize():
        scale = scale_ref[0]
        zp = zp_ref[0]
        # y = scale * (x @ Wq) - (scale * zp) * rowsum(x) + bias
        o_ref[...] = (scale * acc_ref[...]
                      - (scale * zp) * rs_ref[...]
                      + bias_ref[...]).astype(o_ref.dtype)


# ------------------------------- wrapper -------------------------------------
def qlinear_affine8bit(x, wq_t, scale, zero_point, bias, *,
                       tm=256, tn=256, tk=512):
    """y = F.linear(x, scale*(wq - zp), bias), with wq stored as (K, N) uint8.

    x: (..., K) float, wq_t: (K, N) uint8, scale/zero_point: scalars,
    bias: (N,) float.  Returns (..., N) float32.
    """
    *lead, K = x.shape
    Kw, N = wq_t.shape
    assert Kw == K, (Kw, K)
    M = 1
    for d in lead:
        M *= d

    # ---- tile sizes clamped to the (padded) problem ----
    # tn, tk multiples of 128 (lane-dense stores / aligned u8 weight tiles),
    # tm multiple of 16 (bf16 sublane packing).
    # TODO(synk): tiles are generation-dependent; halve tm/tn/tk for v7x's 64 MiB VMEM
    # and raise them (e.g. 512/512/1024 + larger vmem_limit_bytes) on v6e.
    M_pad = _round_up(M, 16)
    K_pad = _round_up(K, 128)
    N_pad = _round_up(N, 128)
    tm = min(tm, M_pad)
    tk = min(tk, K_pad)
    tn = min(tn, N_pad)
    M_pad = _round_up(M_pad, tm)
    K_pad = _round_up(K_pad, tk)
    N_pad = _round_up(N_pad, tn)

    # ---- pad inputs.  Zero-padded K columns of x contribute 0 to both the
    # matmul and the rowsum, so any weight padding value is harmless.
    # (In production, pad the quantized weight / bias once at init, not per call.)
    x2d = x.reshape(M, K).astype(jnp.bfloat16)
    x_p = jnp.zeros((M_pad, K_pad), jnp.bfloat16).at[:M, :K].set(x2d)
    wq_p = jnp.zeros((K_pad, N_pad), jnp.uint8).at[:K, :N].set(wq_t)
    bias_p = jnp.zeros((1, N_pad), jnp.float32).at[0, :N].set(
        bias.astype(jnp.float32))

    scale1 = jnp.reshape(scale, (1,)).astype(jnp.float32)
    zp1 = jnp.reshape(zero_point, (1,)).astype(jnp.float32)

    grid = (M_pad // tm, N_pad // tn, K_pad // tk)

    out = pl.pallas_call(
        _qlinear_kernel,
        out_shape=jax.ShapeDtypeStruct((M_pad, N_pad), jnp.float32),
        grid_spec=pltpu.PrefetchScalarGridSpec(
            num_scalar_prefetch=0,
            grid=grid,
            in_specs=[
                pl.BlockSpec(memory_space=pltpu.SMEM),              # scale (1,)
                pl.BlockSpec(memory_space=pltpu.SMEM),              # zero_point (1,)
                pl.BlockSpec((tm, tk), lambda i, j, k: (i, k)),     # x        bf16
                pl.BlockSpec((tk, tn), lambda i, j, k: (k, j)),     # wq (K,N) u8
                pl.BlockSpec((1, tn), lambda i, j, k: (0, j)),      # bias     f32
            ],
            out_specs=pl.BlockSpec((tm, tn), lambda i, j, k: (i, j)),
            scratch_shapes=[
                pltpu.VMEM((tm, tn), jnp.float32),   # matmul accumulator
                pltpu.VMEM((tm, 1), jnp.float32),    # rowsum(x) accumulator
            ],
        ),
        compiler_params=pltpu.CompilerParams(
            dimension_semantics=("parallel", "parallel", "arbitrary"),
            vmem_limit_bytes=32 * 1024 * 1024,
        ),
    )(scale1, zp1, x_p, wq_p, bias_p)

    return out[:M, :N].reshape(*lead, N)


# ------------------------ quantization setup (glue) ---------------------------
def quantize_affine8bit(weight):
    """Mirrors LinearAffine8bit.__init__ exactly (per-tensor affine uint8).

    The quantized weight is returned pre-transposed to (in_features,
    out_features) so the forward kernel never pays a per-call transpose.
    """
    min_val = jnp.min(weight)
    max_val = jnp.max(weight)
    scale = (max_val - min_val) / 255.0
    zero_point = jnp.round(jnp.clip(255.0 - max_val / scale, 0.0, 255.0))
    wq = jnp.round(jnp.clip(zero_point + weight / scale, 0.0, 255.0)).astype(jnp.uint8)
    return jnp.transpose(wq, (1, 0)), scale, zero_point        # (K, N), scalar, scalar


# ----------------------------------- main --------------------------------------
if __name__ == "__main__":
    key = jax.random.PRNGKey(0)
    k_w, k_b, k_x = jax.random.split(key, 3)

    in_features = 32
    out_features = 16
    batch, seq = 2, 8                                  # x: (2, 8, 32)

    weight = jax.random.normal(k_w, (out_features, in_features), dtype=jnp.float32)
    bias = jax.random.normal(k_b, (out_features,), dtype=jnp.float32)
    x = jax.random.normal(k_x, (batch, seq, in_features), dtype=jnp.float32)

    wq_t, scale, zero_point = quantize_affine8bit(weight)

    y = qlinear_affine8bit(x, wq_t, scale, zero_point, bias)
    y = jax.block_until_ready(y)
    assert y.shape == (batch, seq, out_features)

    # Dequantized weight in (K, N) layout.
    w_deq_t = scale * (wq_t.astype(jnp.float32) - zero_point)

    # Tight reference: exactly what the kernel computes (x rounded to bf16,
    # exact integer weights, f32 accumulation).
    x_bf = x.astype(jnp.bfloat16).astype(jnp.float32)
    y_tight = jnp.einsum("bsk,kn->bsn", x_bf, w_deq_t,
                         precision=jax.lax.Precision.HIGHEST) + bias
    assert jnp.allclose(y, y_tight, atol=1e-3, rtol=1e-3), "mismatch vs tight reference"

    # Loose reference: the module's f32 forward (tolerance covers the bf16
    # activation cast only — the weight path is exact).
    y_f32 = jnp.einsum("bsk,kn->bsn", x, w_deq_t,
                       precision=jax.lax.Precision.HIGHEST) + bias
    assert jnp.allclose(y, y_f32, atol=1e-1, rtol=5e-2), "mismatch vs f32 reference"

    print("KERNEL_OK")
</pallas_src>

<mosaic_0001>
module attributes {stable_mosaic.version = 11 : i64} {
  func.func @_qlinear_kernel(%arg0: i32, %arg1: i32, %arg2: i32, %arg3: memref<1xf32, #tpu.memory_space<smem>>, %arg4: memref<1xf32, #tpu.memory_space<smem>>, %arg5: memref<16x128xbf16, #tpu.memory_space<vmem>>, %arg6: memref<128x128xi8, #tpu.memory_space<vmem>>, %arg7: memref<1x128xf32, #tpu.memory_space<vmem>>, %arg8: memref<16x128xf32, #tpu.memory_space<vmem>>, %arg9: memref<16x128xf32, #tpu.memory_space<vmem>>, %arg10: memref<16x1xf32, #tpu.memory_space<vmem>>) attributes {dimension_semantics = [#tpu.dimension_semantics<parallel>, #tpu.dimension_semantics<parallel>, #tpu.dimension_semantics<arbitrary>], iteration_bounds = array<i64: 1, 1, 1>, scalar_prefetch = 0 : i64, scratch_operands = 2 : i64, tpu.core_type = #tpu.core_type<tc>, window_params = [{transform_indices = @transform_0, window_bounds = array<i64: 1>}, {transform_indices = @transform_1, window_bounds = array<i64: 1>}, {transform_indices = @transform_2, window_bounds = array<i64: 16, 128>}, {transform_indices = @transform_3, window_bounds = array<i64: 128, 128>}, {transform_indices = @transform_4, window_bounds = array<i64: 1, 128>}, {transform_indices = @transform_5, window_bounds = array<i64: 16, 128>}]} {
    %c0_i32 = arith.constant 0 : i32
    %0 = arith.cmpi eq, %arg2, %c0_i32 : i32
    %1 = arith.extui %0 : i1 to i32
    %c0_i32_0 = arith.constant 0 : i32
    %2 = arith.cmpi ne, %1, %c0_i32_0 : i32
    scf.if %2 {
      %cst_15 = arith.constant 0.000000e+00 : f32
      %19 = vector.broadcast %cst_15 : f32 to vector<16x128xf32>
      %c0_16 = arith.constant 0 : index
      %c0_17 = arith.constant 0 : index
      %20 = vector.load %arg9[%c0_16, %c0_17] : memref<16x128xf32, #tpu.memory_space<vmem>>, vector<16x128xf32>
      tpu.vector_store %arg9[%c0_16, %c0_17], %19 {strides = array<i32>} : memref<16x128xf32, #tpu.memory_space<vmem>>, vector<16x128xf32>,
      %cst_18 = arith.constant 0.000000e+00 : f32
      %21 = vector.broadcast %cst_18 : f32 to vector<16x1xf32>
      %c0_19 = arith.constant 0 : index
      %c0_20 = arith.constant 0 : index
      %22 = vector.load %arg10[%c0_19, %c0_20] : memref<16x1xf32, #tpu.memory_space<vmem>>, vector<16x1xf32>
      tpu.vector_store %arg10[%c0_19, %c0_20], %21 {strides = array<i32>} : memref<16x1xf32, #tpu.memory_space<vmem>>, vector<16x1xf32>,
    } else {
    }
    %c0 = arith.constant 0 : index
    %c0_1 = arith.constant 0 : index
    %3 = vector.load %arg5[%c0, %c0_1] : memref<16x128xbf16, #tpu.memory_space<vmem>>, vector<16x128xbf16>
    %c0_2 = arith.constant 0 : index
    %c0_3 = arith.constant 0 : index
    %4 = vector.load %arg6[%c0_2, %c0_3] : memref<128x128xi8, #tpu.memory_space<vmem>>, vector<128x128xi8>
    %5 = arith.uitofp %4 : vector<128x128xi8> to vector<128x128xbf16>
    %c0_4 = arith.constant 0 : index
    %c0_5 = arith.constant 0 : index
    %6 = vector.load %arg9[%c0_4, %c0_5] : memref<16x128xf32, #tpu.memory_space<vmem>>, vector<16x128xf32>
    %cst = arith.constant dense<0.000000e+00> : vector<16x128xf32>
    %7 = tpu.matmul %3, %5, %cst {dimension_numbers = #tpu.dot_dimension_numbers<[1], [0], [0], [1], [0, 0, 1, 1], [], []>} : vector<16x128xbf16>, vector<128x128xbf16>, vector<16x128xf32> -> vector<16x128xf32>
    %8 = arith.addf %6, %7 : vector<16x128xf32>
    %c0_6 = arith.constant 0 : index
    %c0_7 = arith.constant 0 : index
    %9 = vector.load %arg9[%c0_6, %c0_7] : memref<16x128xf32, #tpu.memory_space<vmem>>, vector<16x128xf32>
    tpu.vector_store %arg9[%c0_6, %c0_7], %8 {strides = array<i32>} : memref<16x128xf32, #tpu.memory_space<vmem>>, vector<16x128xf32>,
    %c0_8 = arith.constant 0 : index
    %c0_9 = arith.constant 0 : index
    %10 = vector.load %arg10[%c0_8, %c0_9] : memref<16x1xf32, #tpu.memory_space<vmem>>, vector<16x1xf32>
    %11 = arith.extf %3 : vector<16x128xbf16> to vector<16x128xf32>
    %cst_10 = arith.constant dense<0.000000e+00> : vector<16xf32>
    %12 = vector.multi_reduction <add>, %11, %cst_10 [1] : vector<16x128xf32> to vector<16xf32>
    %13 = vector.shape_cast %12 : vector<16xf32> to vector<16x1xf32>
    %14 = arith.addf %10, %13 : vector<16x1xf32>
    %c0_11 = arith.constant 0 : index
    %c0_12 = arith.constant 0 : index
    %15 = vector.load %arg10[%c0_11, %c0_12] : memref<16x1xf32, #tpu.memory_space<vmem>>, vector<16x1xf32>
    tpu.vector_store %arg10[%c0_11, %c0_12], %14 {strides = array<i32>} : memref<16x1xf32, #tpu.memory_space<vmem>>, vector<16x1xf32>,
    %c0_i32_13 = arith.constant 0 : i32
    %16 = arith.cmpi eq, %arg2, %c0_i32_13 : i32
    %17 = arith.extui %16 : i1 to i32
    %c0_i32_14 = arith.constant 0 : i32
    %18 = arith.cmpi ne, %17, %c0_i32_14 : i32
    scf.if %18 {
      %c0_15 = arith.constant 0 : index
      %19 = memref.load %arg3[%c0_15] : memref<1xf32, #tpu.memory_space<smem>>
      %c0_16 = arith.constant 0 : index
      %20 = memref.load %arg4[%c0_16] : memref<1xf32, #tpu.memory_space<smem>>
      %c0_17 = arith.constant 0 : index
      %c0_18 = arith.constant 0 : index
      %21 = vector.load %arg9[%c0_17, %c0_18] : memref<16x128xf32, #tpu.memory_space<vmem>>, vector<16x128xf32>
      %22 = vector.broadcast %19 : f32 to vector<16x128xf32>
      %23 = arith.mulf %22, %21 : vector<16x128xf32>
      %24 = arith.mulf %19, %20 : f32
      %c0_19 = arith.constant 0 : index
      %c0_20 = arith.constant 0 : index
      %25 = vector.load %arg10[%c0_19, %c0_20] : memref<16x1xf32, #tpu.memory_space<vmem>>, vector<16x1xf32>
      %26 = vector.broadcast %24 : f32 to vector<16x1xf32>
      %27 = arith.mulf %26, %25 : vector<16x1xf32>
      %28 = vector.broadcast %27 : vector<16x1xf32> to vector<16x128xf32>
      %29 = arith.subf %23, %28 : vector<16x128xf32>
      %c0_21 = arith.constant 0 : index
      %c0_22 = arith.constant 0 : index
      %30 = vector.load %arg7[%c0_21, %c0_22] : memref<1x128xf32, #tpu.memory_space<vmem>>, vector<1x128xf32>
      %31 = vector.broadcast %30 : vector<1x128xf32> to vector<16x128xf32>
      %32 = arith.addf %29, %31 : vector<16x128xf32>
      %c0_23 = arith.constant 0 : index
      %c0_24 = arith.constant 0 : index
      %33 = vector.load %arg8[%c0_23, %c0_24] : memref<16x128xf32, #tpu.memory_space<vmem>>, vector<16x128xf32>
      tpu.vector_store %arg8[%c0_23, %c0_24], %32 {strides = array<i32>} : memref<16x128xf32, #tpu.memory_space<vmem>>, vector<16x128xf32>,
    } else {
    }
    return
  }
  func.func @transform_0(%arg0: i32, %arg1: i32, %arg2: i32) -> i32 {
    %c0_i32 = arith.constant 0 : i32
    %c0_i32_0 = arith.constant 0 : i32
    return %c0_i32 : i32
  }
  func.func @transform_1(%arg0: i32, %arg1: i32, %arg2: i32) -> i32 {
    %c0_i32 = arith.constant 0 : i32
    %c0_i32_0 = arith.constant 0 : i32
    return %c0_i32 : i32
  }
  func.func @transform_2(%arg0: i32, %arg1: i32, %arg2: i32) -> (i32, i32) {
    %c0_i32 = arith.constant 0 : i32
    return %arg0, %arg2 : i32, i32
  }
  func.func @transform_3(%arg0: i32, %arg1: i32, %arg2: i32) -> (i32, i32) {
    %c0_i32 = arith.constant 0 : i32
    return %arg2, %arg1 : i32, i32
  }
  func.func @transform_4(%arg0: i32, %arg1: i32, %arg2: i32) -> (i32, i32) {
    %c0_i32 = arith.constant 0 : i32
    %c0_i32_0 = arith.constant 0 : i32
    return %c0_i32, %arg1 : i32, i32
  }
  func.func @transform_5(%arg0: i32, %arg1: i32, %arg2: i32) -> (i32, i32) {
    %c0_i32 = arith.constant 0 : i32
    return %arg0, %arg1 : i32, i32
  }
}

</mosaic_0001>

<bundles_post_ra>
// kernel: tpu_custom_call.1
= control target key start
LH: loop header
LB: loop body
LE: loop exit
PB: predicated region body
PF: predicated region fallthrough
CT: control target
= control target key end

     0   :  { %12 = vsyncpa [#allocation7], 0  ;;  %s380_s0 = inlined_call_operand.<no memory space> [shape: f32[1], index: 0, kind: input, shape index: {}]   ;;  %s381_s1 = inlined_call_operand.<no memory space> [shape: f32[1], index: 1, kind: input, shape index: {}]   ;;  %s382_s2 = inlined_call_operand.hbm [shape: bf16[16,128], index: 2, kind: input, shape index: {}]   ;;  %s383_s3 = inlined_call_operand.hbm [shape: u8[128,128], index: 3, kind: input, shape index: {}]   ;;  %s384_s4 = inlined_call_operand.vmem [shape: f32[1,128], index: 4, kind: input, shape index: {}]   ;;  %s385_s5 = inlined_call_operand.hbm [shape: f32[16,128], index: 5, kind: output, shape index: {}]  }
   0x1   :  { %13 = vsyncpa [#allocation10], 0 }
   0x2   :  { %14 = vsyncpa [#allocation8], 0  ;;  %s309_s18 = smov [#allocation6]  }
   0x3   :  { %s24_s19 = sshll.u32 %s309_s18, 4  ;;  %s25_s19 = int_to_ptr.vmem [resolvable:$true] %s24_s19 }
   0x4   :  { %s251_s20 = scalar_lea.vmem %s25_s19, 128  ;;  %p256_p1 = scmp.lt.s32.totalorder %s25_s19, %s25_s19 }
   0x5   :  { %p252_p0 = scmp.ne.s32.totalorder %s25_s19, %s251_s20  ;;  %p257_p2 = scmp.lt.s32.totalorder %s251_s20, %s251_s20 }
   0x7   :  { %p258_p3 = por %p257_p2, %p256_p1 }
   0x9   :  { %p259_p4 = pnand %p258_p3, %p252_p0 }
   0xb   :  { %262 = shalt.err (!%p259_p4)
}
   0xc   :  { %s310_s21 = smov 64   ;;  %s311_s22 = smov 4  }
   0xd   :  { %30 = dma.hbm_to_vmem [thread:$0]  %s382_s2, 128, %s25_s19, [#allocation7], %s310_s21, %s310_s21, %s311_s22  }
   0xe   :  { %s312_s25 = smov [#allocation9]  }
   0xf   :  { %s36_s26 = sshll.u32 %s312_s25, 4  ;;  %s37_s26 = int_to_ptr.vmem [resolvable:$true] %s36_s26 }
  0x10   :  { %s271_s27 = scalar_lea.vmem %s37_s26, 512  ;;  %p276_p6 = scmp.lt.s32.totalorder %s37_s26, %s37_s26 }
  0x11   :  { %p272_p5 = scmp.ne.s32.totalorder %s37_s26, %s271_s27  ;;  %p277_p7 = scmp.lt.s32.totalorder %s271_s27, %s271_s27 }
  0x13   :  { %p278_p8 = por %p277_p7, %p276_p6 }
  0x15   :  { %p279_p9 = pnand %p278_p8, %p272_p5 }
  0x17   :  { %282 = shalt.err (!%p279_p9)
}
  0x18   :  { %s313_s28 = smov 128   ;;  %s314_s29 = smov 8  }
  0x19   :  { %42 = dma.hbm_to_vmem [thread:$0]  %s383_s3, 512, %s37_s26, [#allocation10], %s313_s28, %s313_s28, %s314_s29  }
  0x1a   :  { %303 = dma.done.wait [#allocation7], 128  }
  0x1b   :  { %304 = vsyncadd [#allocation7], 4294967168 }
  0x1c   :  { %305 = dma.done.wait [#allocation10], 512  }
  0x1d   :  { %306 = vsyncadd [#allocation10], 4294966784  ;;  %vm58_vm0 = vcmask 7168   ;;  %v315_v0 = vmov 0.0   ;;  %vm316_vm1 = vmmov 0   ;;  %v61_v1 = vld [vmem:[#allocation6] sm:$0xff]   ;;  %s151_s9 = smul.f32 %s381_s1, %s380_s0  ;;  %v148_v32 = vstv %s380_s0 }
  0x1e   :  { %209 = vmatprep.subr.bf16.mxu0 %v315_v0  ;;  %225 = vmatprep.mubr.msk.bf16.mxu0 %vm316_vm1, %v315_v0  ;;  %59 = vst.msk [vmem:[#allocation3] sm:$0xff] %vm58_vm0, %v315_v0  ;;  %60 = vst.msk [vmem:[#allocation3 + $0x8] sm:$0xff] %vm58_vm0, %v315_v0  ;;  %v66_v2 = vld [vmem:[#allocation9 + $0x18] sm:$0xff]  ;;  %v130_v3 = vunpack.c.l.bf16 %v61_v1  ;;  %v131_v5 = vunpack.c.h.bf16 %v61_v1  ;;  %v65_v7 = vld [vmem:[#allocation9 + $0x10] sm:$0xff]  ;;  %v317_v13 = vmov 0   ;;  %s318_s13 = smov [#allocation11]  }
  0x1f   :  { %v74_v4 = vunpack.c.h.u8.bf16 %v66_v2  ;;  %v73_v6 = vunpack.c.l.u8.bf16 %v66_v2  ;;  %v72_v8 = vunpack.c.h.u8.bf16 %v65_v7  ;;  %v71_v9 = vunpack.c.l.u8.bf16 %v65_v7  ;;  %v64_v10 = vld [vmem:[#allocation9 + $0x8] sm:$0xff]  ;;  %239 = vset.pattern.permute.xlu1 %v317_v13  ;;  %v63_v14 = vld [vmem:[#allocation9] sm:$0xff]  ;;  %240 = vset.pattern.permute.xlu0 %v317_v13  ;;  %s185_s14 = sshll.u32 %s318_s13, 4  ;;  %s186_s14 = int_to_ptr.vmem [resolvable:$true] %s185_s14 }
  0x20   :  { %132 = vadd.xlane.f32.xlu0 %v130_v3  ;;  %v70_v11 = vunpack.c.h.u8.bf16 %v64_v10  ;;  %v69_v12 = vunpack.c.l.u8.bf16 %v64_v10  ;;  %v68_v15 = vunpack.c.h.u8.bf16 %v63_v14  ;;  %v67_v16 = vunpack.c.l.u8.bf16 %v63_v14  ;;  %v199_v34 = vld [vmem:[%s384_s4] ss:$0 sm:$0xff]  ;;  %s283_s15 = scalar_lea.vmem %s186_s14, 256  ;;  %p288_p11 = scmp.lt.s32.totalorder %s186_s14, %s186_s14 }
  0x21   :  { %210 = vmatpush3.bf16.msra.mxu0 %v74_v4  ;;  %v154_v23 = vstv %s151_s9  ;;  %p284_p10 = scmp.ne.s32.totalorder %s186_s14, %s283_s15  ;;  %p289_p12 = scmp.lt.s32.totalorder %s283_s15, %s283_s15 }
  0x22   :  { %211 = vmatprep.subr.bf16.mxu0 %v315_v0 }
  0x23   :  { %p290_p13 = por %p289_p12, %p288_p11 }
  0x24   :  { %134 = vadd.xlane.f32.xlu0 %v131_v5 }
  0x25   :  { %212 = vmatpush3.bf16.msra.mxu0 %v73_v6  ;;  %v128_v17 = vld [vmem:[#allocation3] sm:$0xff]  ;;  %v129_v20 = vld [vmem:[#allocation3 + $0x8] sm:$0xff]  ;;  %p291_p0 = pnand %p290_p13, %p284_p10 }
  0x26   :  { %213 = vmatprep.subr.bf16.mxu0 %v315_v0 }
  0x29   :  { %214 = vmatpush3.bf16.msra.mxu0 %v72_v8 }
  0x2a   :  { %215 = vmatprep.subr.bf16.mxu0 %v315_v0 }
  0x2d   :  { %216 = vmatpush3.bf16.msra.mxu0 %v71_v9 }
  0x2e   :  { %217 = vmatprep.subr.bf16.mxu0 %v315_v0 }
  0x31   :  { %218 = vmatpush3.bf16.msra.mxu0 %v70_v11 }
  0x32   :  { %219 = vmatprep.subr.bf16.mxu0 %v315_v0 }
  0x35   :  { %220 = vmatpush3.bf16.msra.mxu0 %v69_v12 }
  0x36   :  { %221 = vmatprep.subr.bf16.mxu0 %v315_v0 }
  0x39   :  { %222 = vmatpush3.bf16.msra.mxu0 %v68_v15 }
  0x3a   :  { %223 = vmatprep.subr.bf16.mxu0 %v315_v0 }
  0x3d   :  { %224 = vmatpush3.bf16.msra.mxu0 %v67_v16 }
  0x40   :  { %226 = vmatmul.mubr.bf16.vlgmr.msra.gmra.mxu0 %v61_v1 }
  0xa9   :  { %v133_v18 = vpop.xlane.xlu0 %132 }
  0xaa   :  { %v136_v19 = vadd.f32 %v133_v18, %v128_v17 }
  0xac   :  { %139 = vst.msk [vmem:[#allocation3] sm:$0xff] %vm58_vm0, %v136_v19 }
  0xad   :  { %v135_v21 = vpop.xlane.xlu0 %134 }
  0xae   :  { %v137_v22 = vadd.f32 %v135_v21, %v129_v20 }
  0xb0   :  { %140 = vst.msk [vmem:[#allocation3 + $0x8] sm:$0xff] %vm58_vm0, %v137_v22 }
  0xb3   :  { %v152_v24 = vld [vmem:[#allocation3] sm:$0xff] }
  0xb4   :  { %v155_v25 = vmul.f32 %v154_v23, %v152_v24 }
  0xb6   :  { %159 = vperm.xlu1 %239, %v155_v25  }
  0xb7   :  { %v153_v26 = vld [vmem:[#allocation3 + $0x8] sm:$0xff] }
  0xb8   :  { %v156_v27 = vmul.f32 %v154_v23, %v153_v26 }
  0xba   :  { %164 = vperm.xlu1 %239, %v156_v27  }
 0x100   :  { %v117_v28 = vpop.f32.mrf.mxu0 }
 0x101   :  { %v149_v33 = vmul.f32 %v148_v32, %v117_v28 }
 0x102   :  { %v227_v29 = vpop.f32.mrf.mxu0 }
 0x104   :  { %v120_v30 = vpop.f32.mrf.mxu0 }
 0x105   :  { %v150_v37 = vmul.f32 %v148_v32, %v120_v30 }
 0x106   :  { %v228_v31 = vpop.f32.mrf.mxu0 }
 0x131   :  { %v160_v35 = vpop.permute.xlu1 %159 }
 0x132   :  { %v167_v36 = vsub.f32 %v149_v33, %v160_v35 }
 0x134   :  { %v176_v38 = vadd.f32 %v199_v34, %v167_v36 }
 0x135   :  { %v165_v39 = vpop.permute.xlu1 %164 }
 0x136   :  { %178 = vst [vmem:[#allocation11] sm:$0xff] %v176_v38  ;;  %v168_v40 = vsub.f32 %v150_v37, %v165_v39 }
 0x138   :  { %v177_v41 = vadd.f32 %v199_v34, %v168_v40 }
 0x13a   :  { %179 = vst [vmem:[#allocation11 + $0x8] sm:$0xff] %v177_v41 }
 0x13b   :  { %294 = shalt.err (!%p291_p0)
}
 0x13c   :  { %191 = dma.vmem_to_hbm [thread:$0]  %s186_s14, 256, %s385_s5, [#allocation8], %s313_s28, %s313_s28, %s314_s29  }
 0x13d   :  { %307 = dma.done.wait [#allocation8], 256  }
 0x13e   :  { %308 = vsyncadd [#allocation8], 4294967040 }
 0x13f   :  { %195 = vsyncpa [#allocation7], 1 }
 0x140   :  { %196 = vsyncpa [#allocation10], 1 }
 0x141   :  { %197 = vsyncpa [#allocation8], 1 }

</bundles_post_ra>
